<compile_context>
chip_gen: v6e
topology: v6e:2x2x1
jax: 0.10.0
libtpu: 0.0.40
codegen_flags: <defaults>
</compile_context>

<pallas_src>
import functools

import jax
import jax.numpy as jnp
from jax.experimental import pallas as pl
from jax.experimental.pallas import tpu as pltpu

block_size = 8
n_embed = 32


def _mha_kernel(x_ref, w_ref, o_ref, *, num_heads, head_size):
    # x_ref: (B, T, C)
    # w_ref: (C, 3*num_heads*head_size)  columns = [K heads | Q heads | V heads]
    # o_ref: (B, T, num_heads*head_size) concatenated head outputs
    x = x_ref[...].astype(jnp.float32)
    w = w_ref[...].astype(jnp.float32)

    B, T, C = x.shape
    HT = num_heads * head_size
    scale = C ** (-0.5)                      # quirk: scale by n_embed, not head_size

    # Single fused QKV projection: (B*T, C) @ (C, 3*HT) — one MXU push/pop.
    proj = jnp.dot(x.reshape(B * T, C), w, preferred_element_type=jnp.float32)
    proj = proj.reshape(B, T, 3 * HT)
    k_all = proj[..., 0 * HT:1 * HT]         # (B, T, HT)
    q_all = proj[..., 1 * HT:2 * HT]
    v_all = proj[..., 2 * HT:3 * HT]

    # One XLU transpose per batch, shared by all heads (instead of one per
    # (batch, head) hidden inside a 'bih,bjh->bij' contraction).
    qT_all = jnp.swapaxes(q_all, 1, 2)       # (B, HT, T)

    # Causal mask, computed once and shared by all heads.
    rows = jax.lax.broadcasted_iota(jnp.int32, (T, T), 0)
    cols = jax.lax.broadcasted_iota(jnp.int32, (T, T), 1)
    keep = (cols <= rows)[None, :, :]        # (1, T, T)

    outs = []
    for h in range(num_heads):               # unrolled at trace time (num_heads=4)
        sl = slice(h * head_size, (h + 1) * head_size)
        k = k_all[..., sl]                   # (B, T, hs)   lane slice
        qT = qT_all[:, sl, :]                # (B, hs, T)   8-aligned sublane slice
        v = v_all[..., sl]                   # (B, T, hs)

        # wei = k @ q^T * C**-0.5  (exactly as in the PyTorch Head.forward),
        # now a canonical batched (T,hs)@(hs,T) MXU matmul.
        wei = jnp.einsum('bth,bhs->bts', k, qT,
                         preferred_element_type=jnp.float32) * scale  # (B, T, T)
        wei = jnp.where(keep, wei, -jnp.inf)

        # numerically-stable softmax over the last axis (-inf lanes -> 0)
        m = jnp.max(wei, axis=-1, keepdims=True)
        e = jnp.exp(wei - m)
        denom = jnp.sum(e, axis=-1, keepdims=True)
        p = e * pl.reciprocal(denom, approx=False)

        outs.append(jnp.einsum('bts,bsh->bth', p, v,
                               preferred_element_type=jnp.float32))    # (B, T, hs)

    # Single store of the concatenated heads.
    o_ref[...] = jnp.concatenate(outs, axis=-1).astype(o_ref.dtype)


def pack_qkv_weights(wk, wq, wv):
    """Fuse per-head nn.Linear weights (num_heads, head_size, C) into one (C, 3*HT)
    operand.  Do this ONCE at weight-update/init time, not per forward call."""
    num_heads, head_size, C = wk.shape
    HT = num_heads * head_size
    return jnp.concatenate(
        [wk.reshape(HT, C), wq.reshape(HT, C), wv.reshape(HT, C)], axis=0
    ).T                                       # (C, 3*HT)


def make_multi_head_attention(num_heads, head_size):
    """Returns a jitted fn (x, w_cat) -> (B, T, num_heads*head_size)."""
    kernel = functools.partial(_mha_kernel, num_heads=num_heads, head_size=head_size)
    HT = num_heads * head_size

    @jax.jit
    def mha(x, w_cat):
        B, T, C = x.shape
        # No grid: one invocation, full (tiny) arrays resident in VMEM.
        return pl.pallas_call(
            kernel,
            out_shape=jax.ShapeDtypeStruct((B, T, HT), x.dtype),
            in_specs=[pl.BlockSpec(memory_space=pltpu.MemorySpace.VMEM),
                      pl.BlockSpec(memory_space=pltpu.MemorySpace.VMEM)],
            out_specs=pl.BlockSpec(memory_space=pltpu.MemorySpace.VMEM),
        )(x, w_cat)

    return mha


def _reference(x, wk, wq, wv):
    """Pure-JAX reference mirroring the PyTorch module."""
    B, T, C = x.shape
    outs = []
    for h in range(wk.shape[0]):
        k = x @ wk[h].T
        q = x @ wq[h].T
        v = x @ wv[h].T
        wei = (k @ jnp.swapaxes(q, -2, -1)) * (C ** -0.5)
        mask = jnp.tril(jnp.ones((T, T), dtype=bool))
        wei = jnp.where(mask, wei, -jnp.inf)
        wei = jax.nn.softmax(wei, axis=-1)
        outs.append(wei @ v)
    return jnp.concatenate(outs, axis=-1)


if __name__ == "__main__":
    B = 2
    T = block_size                     # 8
    C = n_embed                        # 32
    num_heads = 4
    head_size = n_embed // num_heads   # 8

    key = jax.random.PRNGKey(0)
    kx, kk, kq, kv = jax.random.split(key, 4)
    x = jax.random.normal(kx, (B, T, C), dtype=jnp.float32)
    # nn.Linear(n_embed, head_size, bias=False) weight shape: (head_size, n_embed)
    scale = 1.0 / jnp.sqrt(n_embed)
    wk = jax.random.uniform(kk, (num_heads, head_size, C), jnp.float32, -scale, scale)
    wq = jax.random.uniform(kq, (num_heads, head_size, C), jnp.float32, -scale, scale)
    wv = jax.random.uniform(kv, (num_heads, head_size, C), jnp.float32, -scale, scale)

    # Weight packing hoisted out of the hot path (done once, like a param update).
    w_cat = jax.block_until_ready(pack_qkv_weights(wk, wq, wv))
    mha = make_multi_head_attention(num_heads, head_size)

    out = mha(x, w_cat)
    out = jax.block_until_ready(out)

    ref = _reference(x, wk, wq, wv)
    assert out.shape == (B, T, num_heads * head_size), out.shape
    assert jnp.allclose(out, ref, atol=1e-5, rtol=1e-5), float(jnp.max(jnp.abs(out - ref)))

    print("KERNEL_OK")
</pallas_src>

<mosaic_0001>
module attributes {stable_mosaic.version = 11 : i64} {
  func.func @_mha_kernel(%arg0: memref<2x8x32xf32, #tpu.memory_space<vmem>>, %arg1: memref<32x96xf32, #tpu.memory_space<vmem>>, %arg2: memref<2x8x32xf32, #tpu.memory_space<vmem>>) attributes {dimension_semantics = [], scalar_prefetch = 0 : i64, scratch_operands = 0 : i64, tpu.core_type = #tpu.core_type<tc>} {
    %c0 = arith.constant 0 : index
    %c0_0 = arith.constant 0 : index
    %c0_1 = arith.constant 0 : index
    %0 = vector.load %arg0[%c0, %c0_0, %c0_1] : memref<2x8x32xf32, #tpu.memory_space<vmem>>, vector<2x8x32xf32>
    %c0_2 = arith.constant 0 : index
    %c0_3 = arith.constant 0 : index
    %1 = vector.load %arg1[%c0_2, %c0_3] : memref<32x96xf32, #tpu.memory_space<vmem>>, vector<32x96xf32>
    %2 = vector.shape_cast %0 : vector<2x8x32xf32> to vector<16x32xf32>
    %cst = arith.constant dense<0.000000e+00> : vector<16x96xf32>
    %3 = tpu.matmul %2, %1, %cst {dimension_numbers = #tpu.dot_dimension_numbers<[1], [0], [0], [1], [0, 0, 1, 1], [], []>} : vector<16x32xf32>, vector<32x96xf32>, vector<16x96xf32> -> vector<16x96xf32>
    %4 = vector.shape_cast %3 : vector<16x96xf32> to vector<2x8x96xf32>
    %5 = vector.extract_strided_slice %4 {offsets = [0, 0, 0], sizes = [2, 8, 32], strides = [1, 1, 1]} : vector<2x8x96xf32> to vector<2x8x32xf32>
    %6 = vector.extract_strided_slice %4 {offsets = [0, 0, 32], sizes = [2, 8, 32], strides = [1, 1, 1]} : vector<2x8x96xf32> to vector<2x8x32xf32>
    %7 = vector.extract_strided_slice %4 {offsets = [0, 0, 64], sizes = [2, 8, 32], strides = [1, 1, 1]} : vector<2x8x96xf32> to vector<2x8x32xf32>
    %8 = tpu.transpose %6, [0, 2, 1] : vector<2x8x32xf32> -> vector<2x32x8xf32>
    %9 = tpu.iota {dimensions = array<i32: 0>} : vector<8x8xi32>
    %10 = tpu.iota {dimensions = array<i32: 1>} : vector<8x8xi32>
    %11 = arith.cmpi sle, %10, %9 : vector<8x8xi32>
    %12 = vector.shape_cast %11 : vector<8x8xi1> to vector<1x8x8xi1>
    %13 = vector.extract_strided_slice %5 {offsets = [0, 0, 0], sizes = [2, 8, 8], strides = [1, 1, 1]} : vector<2x8x32xf32> to vector<2x8x8xf32>
    %14 = vector.extract_strided_slice %8 {offsets = [0, 0, 0], sizes = [2, 8, 8], strides = [1, 1, 1]} : vector<2x32x8xf32> to vector<2x8x8xf32>
    %15 = vector.extract_strided_slice %7 {offsets = [0, 0, 0], sizes = [2, 8, 8], strides = [1, 1, 1]} : vector<2x8x32xf32> to vector<2x8x8xf32>
    "tpu.trace_start"() <{level = 10 : i32, message = "bth,bhs->bts"}> : () -> ()
    %cst_4 = arith.constant dense<0.000000e+00> : vector<2x8x8xf32>
    %16 = tpu.matmul %13, %14, %cst_4 {dimension_numbers = #tpu.dot_dimension_numbers<[2], [1], [1], [2], [0, 0, 0, 1, 1, 2], [0], [0]>} : vector<2x8x8xf32>, vector<2x8x8xf32>, vector<2x8x8xf32> -> vector<2x8x8xf32>
    "tpu.trace_stop"() : () -> ()
    %cst_5 = arith.constant 0.176776692 : f32
    %17 = vector.broadcast %cst_5 : f32 to vector<2x8x8xf32>
    %18 = arith.mulf %16, %17 : vector<2x8x8xf32>
    %cst_6 = arith.constant 0xFF800000 : f32
    %19 = vector.shape_cast %12 : vector<1x8x8xi1> to vector<1x8x8xi1>
    %20 = vector.broadcast %19 : vector<1x8x8xi1> to vector<2x8x8xi1>
    %21 = vector.broadcast %cst_6 : f32 to vector<2x8x8xf32>
    %22 = arith.select %20, %18, %21 : vector<2x8x8xi1>, vector<2x8x8xf32>
    %cst_7 = arith.constant dense<0xFF800000> : vector<2x8xf32>
    %23 = vector.multi_reduction <maximumf>, %22, %cst_7 [2] : vector<2x8x8xf32> to vector<2x8xf32>
    %24 = vector.shape_cast %23 : vector<2x8xf32> to vector<2x8x1xf32>
    %25 = vector.broadcast %24 : vector<2x8x1xf32> to vector<2x8x8xf32>
    %26 = arith.subf %22, %25 : vector<2x8x8xf32>
    %27 = math.exp %26 : vector<2x8x8xf32>
    %cst_8 = arith.constant dense<0.000000e+00> : vector<2x8xf32>
    %28 = vector.multi_reduction <add>, %27, %cst_8 [2] : vector<2x8x8xf32> to vector<2x8xf32>
    %29 = vector.shape_cast %28 : vector<2x8xf32> to vector<2x8x1xf32>
    %30 = tpu.reciprocal %29 : vector<2x8x1xf32> -> vector<2x8x1xf32>
    %31 = vector.broadcast %30 : vector<2x8x1xf32> to vector<2x8x8xf32>
    %32 = arith.mulf %27, %31 : vector<2x8x8xf32>
    "tpu.trace_start"() <{level = 10 : i32, message = "bts,bsh->bth"}> : () -> ()
    %cst_9 = arith.constant dense<0.000000e+00> : vector<2x8x8xf32>
    %33 = tpu.matmul %32, %15, %cst_9 {dimension_numbers = #tpu.dot_dimension_numbers<[2], [1], [1], [2], [0, 0, 0, 1, 1, 2], [0], [0]>} : vector<2x8x8xf32>, vector<2x8x8xf32>, vector<2x8x8xf32> -> vector<2x8x8xf32>
    "tpu.trace_stop"() : () -> ()
    %34 = vector.extract_strided_slice %5 {offsets = [0, 0, 8], sizes = [2, 8, 8], strides = [1, 1, 1]} : vector<2x8x32xf32> to vector<2x8x8xf32>
    %35 = vector.extract_strided_slice %8 {offsets = [0, 8, 0], sizes = [2, 8, 8], strides = [1, 1, 1]} : vector<2x32x8xf32> to vector<2x8x8xf32>
    %36 = vector.extract_strided_slice %7 {offsets = [0, 0, 8], sizes = [2, 8, 8], strides = [1, 1, 1]} : vector<2x8x32xf32> to vector<2x8x8xf32>
    "tpu.trace_start"() <{level = 10 : i32, message = "bth,bhs->bts"}> : () -> ()
    %cst_10 = arith.constant dense<0.000000e+00> : vector<2x8x8xf32>
    %37 = tpu.matmul %34, %35, %cst_10 {dimension_numbers = #tpu.dot_dimension_numbers<[2], [1], [1], [2], [0, 0, 0, 1, 1, 2], [0], [0]>} : vector<2x8x8xf32>, vector<2x8x8xf32>, vector<2x8x8xf32> -> vector<2x8x8xf32>
    "tpu.trace_stop"() : () -> ()
    %cst_11 = arith.constant 0.176776692 : f32
    %38 = vector.broadcast %cst_11 : f32 to vector<2x8x8xf32>
    %39 = arith.mulf %37, %38 : vector<2x8x8xf32>
    %cst_12 = arith.constant 0xFF800000 : f32
    %40 = vector.shape_cast %12 : vector<1x8x8xi1> to vector<1x8x8xi1>
    %41 = vector.broadcast %40 : vector<1x8x8xi1> to vector<2x8x8xi1>
    %42 = vector.broadcast %cst_12 : f32 to vector<2x8x8xf32>
    %43 = arith.select %41, %39, %42 : vector<2x8x8xi1>, vector<2x8x8xf32>
    %cst_13 = arith.constant dense<0xFF800000> : vector<2x8xf32>
    %44 = vector.multi_reduction <maximumf>, %43, %cst_13 [2] : vector<2x8x8xf32> to vector<2x8xf32>
    %45 = vector.shape_cast %44 : vector<2x8xf32> to vector<2x8x1xf32>
    %46 = vector.broadcast %45 : vector<2x8x1xf32> to vector<2x8x8xf32>
    %47 = arith.subf %43, %46 : vector<2x8x8xf32>
    %48 = math.exp %47 : vector<2x8x8xf32>
    %cst_14 = arith.constant dense<0.000000e+00> : vector<2x8xf32>
    %49 = vector.multi_reduction <add>, %48, %cst_14 [2] : vector<2x8x8xf32> to vector<2x8xf32>
    %50 = vector.shape_cast %49 : vector<2x8xf32> to vector<2x8x1xf32>
    %51 = tpu.reciprocal %50 : vector<2x8x1xf32> -> vector<2x8x1xf32>
    %52 = vector.broadcast %51 : vector<2x8x1xf32> to vector<2x8x8xf32>
    %53 = arith.mulf %48, %52 : vector<2x8x8xf32>
    "tpu.trace_start"() <{level = 10 : i32, message = "bts,bsh->bth"}> : () -> ()
    %cst_15 = arith.constant dense<0.000000e+00> : vector<2x8x8xf32>
    %54 = tpu.matmul %53, %36, %cst_15 {dimension_numbers = #tpu.dot_dimension_numbers<[2], [1], [1], [2], [0, 0, 0, 1, 1, 2], [0], [0]>} : vector<2x8x8xf32>, vector<2x8x8xf32>, vector<2x8x8xf32> -> vector<2x8x8xf32>
    "tpu.trace_stop"() : () -> ()
    %55 = vector.extract_strided_slice %5 {offsets = [0, 0, 16], sizes = [2, 8, 8], strides = [1, 1, 1]} : vector<2x8x32xf32> to vector<2x8x8xf32>
    %56 = vector.extract_strided_slice %8 {offsets = [0, 16, 0], sizes = [2, 8, 8], strides = [1, 1, 1]} : vector<2x32x8xf32> to vector<2x8x8xf32>
    %57 = vector.extract_strided_slice %7 {offsets = [0, 0, 16], sizes = [2, 8, 8], strides = [1, 1, 1]} : vector<2x8x32xf32> to vector<2x8x8xf32>
    "tpu.trace_start"() <{level = 10 : i32, message = "bth,bhs->bts"}> : () -> ()
    %cst_16 = arith.constant dense<0.000000e+00> : vector<2x8x8xf32>
    %58 = tpu.matmul %55, %56, %cst_16 {dimension_numbers = #tpu.dot_dimension_numbers<[2], [1], [1], [2], [0, 0, 0, 1, 1, 2], [0], [0]>} : vector<2x8x8xf32>, vector<2x8x8xf32>, vector<2x8x8xf32> -> vector<2x8x8xf32>
    "tpu.trace_stop"() : () -> ()
    %cst_17 = arith.constant 0.176776692 : f32
    %59 = vector.broadcast %cst_17 : f32 to vector<2x8x8xf32>
    %60 = arith.mulf %58, %59 : vector<2x8x8xf32>
    %cst_18 = arith.constant 0xFF800000 : f32
    %61 = vector.shape_cast %12 : vector<1x8x8xi1> to vector<1x8x8xi1>
    %62 = vector.broadcast %61 : vector<1x8x8xi1> to vector<2x8x8xi1>
    %63 = vector.broadcast %cst_18 : f32 to vector<2x8x8xf32>
    %64 = arith.select %62, %60, %63 : vector<2x8x8xi1>, vector<2x8x8xf32>
    %cst_19 = arith.constant dense<0xFF800000> : vector<2x8xf32>
    %65 = vector.multi_reduction <maximumf>, %64, %cst_19 [2] : vector<2x8x8xf32> to vector<2x8xf32>
    %66 = vector.shape_cast %65 : vector<2x8xf32> to vector<2x8x1xf32>
    %67 = vector.broadcast %66 : vector<2x8x1xf32> to vector<2x8x8xf32>
    %68 = arith.subf %64, %67 : vector<2x8x8xf32>
    %69 = math.exp %68 : vector<2x8x8xf32>
    %cst_20 = arith.constant dense<0.000000e+00> : vector<2x8xf32>
    %70 = vector.multi_reduction <add>, %69, %cst_20 [2] : vector<2x8x8xf32> to vector<2x8xf32>
    %71 = vector.shape_cast %70 : vector<2x8xf32> to vector<2x8x1xf32>
    %72 = tpu.reciprocal %71 : vector<2x8x1xf32> -> vector<2x8x1xf32>
    %73 = vector.broadcast %72 : vector<2x8x1xf32> to vector<2x8x8xf32>
    %74 = arith.mulf %69, %73 : vector<2x8x8xf32>
    "tpu.trace_start"() <{level = 10 : i32, message = "bts,bsh->bth"}> : () -> ()
    %cst_21 = arith.constant dense<0.000000e+00> : vector<2x8x8xf32>
    %75 = tpu.matmul %74, %57, %cst_21 {dimension_numbers = #tpu.dot_dimension_numbers<[2], [1], [1], [2], [0, 0, 0, 1, 1, 2], [0], [0]>} : vector<2x8x8xf32>, vector<2x8x8xf32>, vector<2x8x8xf32> -> vector<2x8x8xf32>
    "tpu.trace_stop"() : () -> ()
    %76 = vector.extract_strided_slice %5 {offsets = [0, 0, 24], sizes = [2, 8, 8], strides = [1, 1, 1]} : vector<2x8x32xf32> to vector<2x8x8xf32>
    %77 = vector.extract_strided_slice %8 {offsets = [0, 24, 0], sizes = [2, 8, 8], strides = [1, 1, 1]} : vector<2x32x8xf32> to vector<2x8x8xf32>
    %78 = vector.extract_strided_slice %7 {offsets = [0, 0, 24], sizes = [2, 8, 8], strides = [1, 1, 1]} : vector<2x8x32xf32> to vector<2x8x8xf32>
    "tpu.trace_start"() <{level = 10 : i32, message = "bth,bhs->bts"}> : () -> ()
    %cst_22 = arith.constant dense<0.000000e+00> : vector<2x8x8xf32>
    %79 = tpu.matmul %76, %77, %cst_22 {dimension_numbers = #tpu.dot_dimension_numbers<[2], [1], [1], [2], [0, 0, 0, 1, 1, 2], [0], [0]>} : vector<2x8x8xf32>, vector<2x8x8xf32>, vector<2x8x8xf32> -> vector<2x8x8xf32>
    "tpu.trace_stop"() : () -> ()
    %cst_23 = arith.constant 0.176776692 : f32
    %80 = vector.broadcast %cst_23 : f32 to vector<2x8x8xf32>
    %81 = arith.mulf %79, %80 : vector<2x8x8xf32>
    %cst_24 = arith.constant 0xFF800000 : f32
    %82 = vector.shape_cast %12 : vector<1x8x8xi1> to vector<1x8x8xi1>
    %83 = vector.broadcast %82 : vector<1x8x8xi1> to vector<2x8x8xi1>
    %84 = vector.broadcast %cst_24 : f32 to vector<2x8x8xf32>
    %85 = arith.select %83, %81, %84 : vector<2x8x8xi1>, vector<2x8x8xf32>
    %cst_25 = arith.constant dense<0xFF800000> : vector<2x8xf32>
    %86 = vector.multi_reduction <maximumf>, %85, %cst_25 [2] : vector<2x8x8xf32> to vector<2x8xf32>
    %87 = vector.shape_cast %86 : vector<2x8xf32> to vector<2x8x1xf32>
    %88 = vector.broadcast %87 : vector<2x8x1xf32> to vector<2x8x8xf32>
    %89 = arith.subf %85, %88 : vector<2x8x8xf32>
    %90 = math.exp %89 : vector<2x8x8xf32>
    %cst_26 = arith.constant dense<0.000000e+00> : vector<2x8xf32>
    %91 = vector.multi_reduction <add>, %90, %cst_26 [2] : vector<2x8x8xf32> to vector<2x8xf32>
    %92 = vector.shape_cast %91 : vector<2x8xf32> to vector<2x8x1xf32>
    %93 = tpu.reciprocal %92 : vector<2x8x1xf32> -> vector<2x8x1xf32>
    %94 = vector.broadcast %93 : vector<2x8x1xf32> to vector<2x8x8xf32>
    %95 = arith.mulf %90, %94 : vector<2x8x8xf32>
    "tpu.trace_start"() <{level = 10 : i32, message = "bts,bsh->bth"}> : () -> ()
    %cst_27 = arith.constant dense<0.000000e+00> : vector<2x8x8xf32>
    %96 = tpu.matmul %95, %78, %cst_27 {dimension_numbers = #tpu.dot_dimension_numbers<[2], [1], [1], [2], [0, 0, 0, 1, 1, 2], [0], [0]>} : vector<2x8x8xf32>, vector<2x8x8xf32>, vector<2x8x8xf32> -> vector<2x8x8xf32>
    "tpu.trace_stop"() : () -> ()
    %97 = tpu.concatenate %33, %54, %75, %96 in 2 : vector<2x8x8xf32>, vector<2x8x8xf32>, vector<2x8x8xf32>, vector<2x8x8xf32> -> vector<2x8x32xf32>
    %c0_28 = arith.constant 0 : index
    %c0_29 = arith.constant 0 : index
    %c0_30 = arith.constant 0 : index
    %98 = vector.load %arg2[%c0_28, %c0_29, %c0_30] : memref<2x8x32xf32, #tpu.memory_space<vmem>>, vector<2x8x32xf32>
    tpu.vector_store %arg2[%c0_28, %c0_29, %c0_30], %97 {strides = array<i32>} : memref<2x8x32xf32, #tpu.memory_space<vmem>>, vector<2x8x32xf32>,
    return
  }
}

</mosaic_0001>

<bundles_post_ra>
// kernel: mha.1
= control target key start
LH: loop header
LB: loop body
LE: loop exit
PB: predicated region body
PF: predicated region fallthrough
CT: control target
= control target key end

     0   :  { %7 = vsyncpa [#allocation3], 0  ;;  %s2004_s0 = inlined_call_operand.hbm [shape: f32[2,8,32], index: 0, kind: input, shape index: {}]   ;;  %s2005_s1 = inlined_call_operand.hbm [shape: f32[32,96], index: 1, kind: input, shape index: {}]   ;;  %s2006_s2 = inlined_call_operand.hbm [shape: f32[2,8,32], index: 2, kind: output, shape index: {}]  }
   0x1   :  { %8 = vsyncpa [#allocation6], 0 }
   0x2   :  { %9 = vsyncpa [#allocation4], 0  ;;  %s1795_s9 = smov [#allocation2]  }
   0x3   :  { %s15_s10 = sshll.u32 %s1795_s9, 4  ;;  %s16_s10 = int_to_ptr.vmem [resolvable:$true] %s15_s10 }
   0x4   :  { %s1737_s11 = scalar_lea.vmem %s16_s10, 256  ;;  %p1742_p1 = scmp.lt.s32.totalorder %s16_s10, %s16_s10 }
   0x5   :  { %p1738_p0 = scmp.ne.s32.totalorder %s16_s10, %s1737_s11  ;;  %p1743_p2 = scmp.lt.s32.totalorder %s1737_s11, %s1737_s11 }
   0x7   :  { %p1744_p3 = por %p1743_p2, %p1742_p1 }
   0x9   :  { %p1745_p4 = pnand %p1744_p3, %p1738_p0 }
   0xb   :  { %1748 = shalt.err (!%p1745_p4)
}
   0xc   :  { %s1796_s12 = smov 128   ;;  %s1797_s13 = smov 8  }
   0xd   :  { %21 = dma.hbm_to_vmem [thread:$0]  %s2004_s0, 256, %s16_s10, [#allocation3], %s1796_s12, %s1796_s12, %s1797_s13  }
   0xe   :  { %s1798_s16 = smov [#allocation5]  }
   0xf   :  { %s27_s17 = sshll.u32 %s1798_s16, 4  ;;  %s28_s17 = int_to_ptr.vmem [resolvable:$true] %s27_s17 }
  0x10   :  { %s1757_s18 = scalar_lea.vmem %s28_s17, 512  ;;  %p1762_p6 = scmp.lt.s32.totalorder %s28_s17, %s28_s17 }
  0x11   :  { %p1758_p5 = scmp.ne.s32.totalorder %s28_s17, %s1757_s18  ;;  %p1763_p7 = scmp.lt.s32.totalorder %s1757_s18, %s1757_s18 }
  0x13   :  { %p1764_p8 = por %p1763_p7, %p1762_p6 }
  0x15   :  { %p1765_p9 = pnand %p1764_p8, %p1758_p5 }
  0x17   :  { %1768 = shalt.err (!%p1765_p9)
}
  0x18   :  { %33 = dma.hbm_to_vmem [thread:$0]  %s2005_s1, 512, %s28_s17, [#allocation6], %s1796_s12, %s1796_s12, %s1797_s13  }
  0x19   :  { %1789 = dma.done.wait [#allocation3], 256  }
  0x1a   :  { %1790 = vsyncadd [#allocation3], 4294967040 }
  0x1b   :  { %1791 = dma.done.wait [#allocation6], 512  }
  0x1c   :  { %1792 = vsyncadd [#allocation6], 4294966784  ;;  %vm46_vm0 = vcmask 261120   ;;  %v45_v0 = vld [vmem:[#allocation5 + $0x18] sm:$0xff]  ;;  %v44_v1 = vld [vmem:[#allocation5 + $0x10] sm:$0xff]  ;;  %v1799_v6 = vmov 0.0   ;;  %v128_v11 = vlaneseq }
  0x1d   :  { %1586 = vmatprep.subr.mxu0 %v45_v0  ;;  %v40_v2 = vld [vmem:[#allocation2] sm:$0xff]  ;;  %v43_v3 = vld [vmem:[#allocation5 + $0x8] sm:$0xff]  ;;  %v42_v4 = vld [vmem:[#allocation5] sm:$0xff]  ;;  %1597 = vmatprep.subr.mxu1 %v1799_v6  ;;  %vm1800_vm1 = vmmov 0   ;;  %s1801_s0 = smov 96   ;;  %vm136_vm2 = vcmask 64512  }
  0x1e   :  { %1587 = vmatpush3.msra.mxu0 %v45_v0  ;;  %1594 = vmatprep.mubr.msk.f32.mxu0 %vm46_vm0, %v40_v2  ;;  %v41_v5 = vld [vmem:[#allocation2 + $0x8] sm:$0xff]  ;;  %v129_v12 = vshrl.u32 %v128_v11, 7  ;;  %v131_v13 = vand.u32 127, %v128_v11  ;;  %s1802_s1 = smov 64   ;;  %s1803_s21 = smov 88   ;;  %vm1499_vm4 = vcmask 195584  }
  0x1f   :  { %1588 = vmatprep.subr.mxu0 %v44_v1  ;;  %1599 = vmatprep.mubr.msk.f32.mxu1 %vm1800_vm1, %v1799_v6  ;;  %s1804_s22 = smov 120   ;;  %s1805_s23 = smov 56   ;;  %vm1496_vm5 = vcmask 130048  }
  0x20   :  { %1589 = vmatpush3.msra.mxu0 %v44_v1  ;;  %vm1868_vm3 = vcmp.le.s32.totalorder %v131_v13, %v129_v12  ;;  %s1806_s24 = smov 80   ;;  %s1807_s25 = smov 112  }
  0x21   :  { %1590 = vmatprep.subr.mxu0 %v43_v3  ;;  %s1808_s26 = smov 48   ;;  %s1809_s27 = smov 72  }
  0x22   :  { %1591 = vmatpush3.msra.mxu0 %v43_v3  ;;  %s1810_s28 = smov 104   ;;  %s1811_s29 = smov 40  }
  0x23   :  { %1592 = vmatprep.subr.mxu0 %v42_v4  ;;  %s1812_s30 = smov 16   ;;  %s1813_s3 = smov 24  }
  0x24   :  { %1593 = vmatpush3.msra.mxu0 %v42_v4  ;;  %s1814_s4 = smov [#allocation7]  }
  0x25   :  { %1595 = vmatmul.mubr.msk.f32.vlgmr.msra.gmra.mxu0 %vm46_vm0, %v41_v5  ;;  %1607 = vmatprep.subr.mxu0 %v1799_v6  ;;  %s1509_s5 = sshll.u32 %s1814_s4, 4  ;;  %s1510_s5 = int_to_ptr.vmem [resolvable:$true] %s1509_s5 }
  0x26   :  { %1609 = vmatprep.mubr.msk.f32.mxu0 %vm1800_vm1, %v1799_v6  ;;  %s1769_s6 = scalar_lea.vmem %s1510_s5, 256  ;;  %p1774_p11 = scmp.lt.s32.totalorder %s1510_s5, %s1510_s5 }
  0x27   :  { %p1770_p10 = scmp.ne.s32.totalorder %s1510_s5, %s1769_s6  ;;  %p1775_p12 = scmp.lt.s32.totalorder %s1769_s6, %s1769_s6 }
  0x29   :  { %p1776_p13 = por %p1775_p12, %p1774_p11 }
  0x2b   :  { %p1777_p0 = pnand %p1776_p13, %p1770_p10 }
  0xe5   :  { %v1850_v7 = vpop.f32.mrf.mxu0 }
  0xe7   :  { %v1852_v8 = vpop.f32.mrf.mxu0 }
  0xe8   :  { %134 = vrot.lane.b32.xlu0 %v1852_v8, %s1801_s0 }
  0xec   :  { %212 = vrot.lane.b32.xlu0 %v1850_v7, %s1801_s0 }
 0x15a   :  { %v135_v9 = vpop.permute.xlu0 %134 }
 0x15b   :  { %1598 = vmatpush3.xpose.msk.msra.mxu1 %vm136_vm2, %v135_v9 }
 0x15c   :  { %1602 = vmatprep.subr.mxu1 %v1799_v6 }
 0x15e   :  { %1600 = vmatmul.mubr.msk.f32.vlgmr.msra.gmra.mxu1 %vm136_vm2, %v1852_v8  ;;  %v213_v10 = vpop.permute.xlu0 %212 }
 0x15f   :  { %1603 = vmatpush3.xpose.msk.msra.mxu1 %vm136_vm2, %v213_v10  ;;  %1604 = vmatprep.mubr.msk.f32.mxu1 %vm1800_vm1, %v1799_v6 }
 0x160   :  { %1612 = vmatprep.subr.mxu1 %v1799_v6 }
 0x162   :  { %1605 = vmatmul.mubr.msk.f32.vlgmr.msra.gmra.mxu1 %vm136_vm2, %v1850_v7 }
 0x163   :  { %1614 = vmatprep.mubr.msk.f32.mxu1 %vm1800_vm1, %v1799_v6 }
 0x21e   :  { %v207_v14 = vpop.f32.mrf.mxu1 }
 0x21f   :  { %v288_v16 = vmul.f32 0.17677669, %v207_v14 }
 0x220   :  { %v1601_v17 = vpop.f32.mrf.mxu1 }
 0x221   :  { %v292_v18 = vsel %vm1868_vm3, %v288_v16, -inf }
 0x222   :  { %v284_v19 = vpop.f32.mrf.mxu1  ;;  %v294_v20 = vsel %vm136_vm2, %v292_v18, -inf }
 0x223   :  { %v289_v21 = vmul.f32 0.17677669, %v284_v19  ;;  %295 = vmax.xlane.f32.xlu1 %v294_v20 }
 0x224   :  { %v1606_v22 = vpop.f32.mrf.mxu1 }
 0x225   :  { %v293_v23 = vsel %vm1868_vm3, %v289_v21, -inf }
 0x226   :  { %v297_v24 = vsel %vm136_vm2, %v293_v23, -inf }
 0x227   :  { %298 = vmax.xlane.f32.xlu1 %v297_v24 }
 0x238   :  { %316 = vrot.lane.b32.xlu1 %v1852_v8, %s1802_s1 }
 0x23c   :  { %392 = vrot.lane.b32.xlu1 %v1850_v7, %s1802_s1 }
 0x240   :  { %470 = vrot.lane.b32.xlu1 %v1852_v8, %s1803_s21 }
 0x244   :  { %548 = vrot.lane.b32.xlu1 %v1850_v7, %s1803_s21 }
 0x2ac   :  { %v296_v25 = vpop.xlane.xlu1 %295 }
 0x2ad   :  { %v300_v26 = vsub.f32 %v292_v18, %v296_v25 }
 0x2af   :  { %v302_v27 = vmul.f32 1.442695, %v300_v26 }
 0x2b0   :  { %v299_v28 = vpop.xlane.xlu1 %298 }
 0x2b1   :  { %1697 = vpow2.f32 %v302_v27  ;;  %v301_v29 = vsub.f32 %v293_v23, %v299_v28 }
 0x2b3   :  { %v304_v30 = vmul.f32 1.442695, %v301_v29 }
 0x2b4   :  { %v317_v31 = vpop.permute.xlu1 %316 }
 0x2b5   :  { %1699 = vpow2.f32 %v304_v30  ;;  %1608 = vmatpush3.msra.mxu0 %v317_v31 }
 0x2b6   :  { %1617 = vmatprep.subr.mxu0 %v1799_v6 }
 0x2b8   :  { %v393_v32 = vpop.permute.xlu1 %392 }
 0x2b9   :  { %1613 = vmatpush3.msra.mxu1 %v393_v32 }
 0x2ba   :  { %1622 = vmatprep.subr.mxu1 %v1799_v6 }
 0x2bc   :  { %v471_v37 = vpop.permute.xlu1 %470 }
 0x2be   :  { %v1698_v33 = vpop.eup %1697 }
 0x2bf   :  { %v306_v34 = vsel %vm136_vm2, %v1698_v33, 0.0 }
 0x2c0   :  { %307 = vadd.xlane.f32.xlu0 %v306_v34  ;;  %v549_v38 = vpop.permute.xlu1 %548 }
 0x2c2   :  { %v1700_v35 = vpop.eup %1699 }
 0x2c3   :  { %v309_v36 = vsel %vm136_vm2, %v1700_v35, 0.0 }
 0x2c4   :  { %310 = vadd.xlane.f32.xlu1 %v309_v36 }
 0x2d5   :  { %546 = vrot.lane.b32.xlu1 %v1850_v7, %s1804_s22 }
 0x2d6   :  { %468 = vrot.lane.b32.xlu0 %v1852_v8, %s1804_s22 }
 0x349   :  { %v308_v39 = vpop.xlane.xlu0 %307 }
 0x34a   :  { %1701 = vrcp.f32 %v308_v39 }
 0x34d   :  { %v311_v40 = vpop.xlane.xlu1 %310  ;;  %v469_v45 = vpop.permute.xlu0 %468 }
 0x34e   :  { %1703 = vrcp.f32 %v311_v40 }
 0x351   :  { %v547_v46 = vpop.permute.xlu1 %546 }
 0x357   :  { %v1702_v41 = vpop.eup %1701 }
 0x358   :  { %v314_v42 = vmul.f32 %v1702_v41, %v1698_v33 }
 0x35a   :  { %1610 = vmatmul.mubr.msk.f32.vlgmr.msra.gmra.mxu0 %vm136_vm2, %v314_v42 }
 0x35b   :  { %v1704_v43 = vpop.eup %1703  ;;  %1618 = vmatpush3.xpose.msk.msra.mxu0 %vm136_vm2, %v471_v37  ;;  %1619 = vmatprep.mubr.msk.f32.mxu0 %vm1800_vm1, %v1799_v6 }
 0x35c   :  { %v315_v44 = vmul.f32 %v1704_v43, %v1700_v35  ;;  %1627 = vmatprep.subr.mxu0 %v1799_v6 }
 0x35e   :  { %1615 = vmatmul.mubr.msk.f32.vlgmr.msra.gmra.mxu1 %vm136_vm2, %v315_v44  ;;  %1620 = vmatmul.mubr.msk.f32.vlgmr.msra.gmra.mxu0 %vm136_vm2, %v469_v45 }
 0x35f   :  { %1623 = vmatpush3.xpose.msk.msra.mxu1 %vm136_vm2, %v549_v38  ;;  %1624 = vmatprep.mubr.msk.f32.mxu1 %vm1800_vm1, %v1799_v6 }
 0x360   :  { %1632 = vmatprep.subr.mxu1 %v1799_v6  ;;  %1629 = vmatprep.mubr.msk.f32.mxu0 %vm1800_vm1, %v1799_v6 }
 0x362   :  { %1625 = vmatmul.mubr.msk.f32.vlgmr.msra.gmra.mxu1 %vm136_vm2, %v547_v46 }
 0x363   :  { %1634 = vmatprep.mubr.msk.f32.mxu1 %vm1800_vm1, %v1799_v6 }
 0x41a   :  { %v1904_v47 = vpop.f32.mrf.mxu0 }
 0x41c   :  { %v1611_v48 = vpop.f32.mrf.mxu0 }
 0x41e   :  { %v1906_v49 = vpop.f32.mrf.mxu1  ;;  %v542_v50 = vpop.f32.mrf.mxu0 }
 0x41f   :  { %v624_v51 = vmul.f32 0.17677669, %v542_v50 }
 0x420   :  { %v1616_v52 = vpop.f32.mrf.mxu1  ;;  %v1621_v53 = vpop.f32.mrf.mxu0 }
 0x421   :  { %v626_v54 = vsel %vm1868_vm3, %v624_v51, -inf }
 0x422   :  { %v620_v55 = vpop.f32.mrf.mxu1  ;;  %v628_v56 = vsel %vm136_vm2, %v626_v54, -inf }
 0x423   :  { %v625_v57 = vmul.f32 0.17677669, %v620_v55  ;;  %629 = vmax.xlane.f32.xlu1 %v628_v56 }
 0x424   :  { %v1626_v58 = vpop.f32.mrf.mxu1 }
 0x425   :  { %v627_v59 = vsel %vm1868_vm3, %v625_v57, -inf }
 0x426   :  { %v631_v60 = vsel %vm136_vm2, %v627_v59, -inf }
 0x427   :  { %632 = vmax.xlane.f32.xlu0 %v631_v60 }
 0x434   :  { %650 = vrot.lane.b32.xlu1 %v1852_v8, %s1805_s23 }
 0x438   :  { %804 = vrot.lane.b32.xlu1 %v1852_v8, %s1806_s24 }
 0x43c   :  { %882 = vrot.lane.b32.xlu1 %v1850_v7, %s1806_s24 }
 0x43d   :  { %726 = vrot.lane.b32.xlu0 %v1850_v7, %s1805_s23 }
 0x441   :  { %802 = vrot.lane.b32.xlu0 %v1852_v8, %s1807_s25 }
 0x4ac   :  { %v630_v61 = vpop.xlane.xlu1 %629 }
 0x4ad   :  { %v634_v62 = vsub.f32 %v626_v54, %v630_v61 }
 0x4af   :  { %v636_v63 = vmul.f32 1.442695, %v634_v62 }
 0x4b0   :  { %v651_v0 = vpop.permute.xlu1 %650  ;;  %v633_v1 = vpop.xlane.xlu0 %632 }
 0x4b1   :  { %1705 = vpow2.f32 %v636_v63  ;;  %v635_v2 = vsub.f32 %v627_v59, %v633_v1  ;;  %1628 = vmatpush3.msra.mxu0 %v651_v0 }
 0x4b2   :  { %1637 = vmatprep.subr.mxu0 %v1799_v6 }
 0x4b3   :  { %v638_v3 = vmul.f32 1.442695, %v635_v2 }
 0x4b4   :  { %v727_v4 = vpop.permute.xlu0 %726  ;;  %v805_v12 = vpop.permute.xlu1 %804 }
 0x4b5   :  { %1707 = vpow2.f32 %v638_v3  ;;  %1633 = vmatpush3.msra.mxu1 %v727_v4 }
 0x4b6   :  { %1642 = vmatprep.subr.mxu1 %v1799_v6 }
 0x4b8   :  { %v883_v13 = vpop.permute.xlu1 %882  ;;  %v803_v21 = vpop.permute.xlu0 %802 }
 0x4be   :  { %v1706_v5 = vpop.eup %1705 }
 0x4bf   :  { %v640_v9 = vsel %vm136_vm2, %v1706_v5, 0.0 }
 0x4c0   :  { %641 = vadd.xlane.f32.xlu1 %v640_v9 }
 0x4c2   :  { %v1708_v10 = vpop.eup %1707 }
 0x4c3   :  { %v643_v11 = vsel %vm136_vm2, %v1708_v10, 0.0 }
 0x4c4   :  { %644 = vadd.xlane.f32.xlu1 %v643_v11 }
 0x4d5   :  { %880 = vrot.lane.b32.xlu1 %v1850_v7, %s1807_s25 }
 0x549   :  { %v642_v14 = vpop.xlane.xlu1 %641 }
 0x54a   :  { %1709 = vrcp.f32 %v642_v14 }
 0x54d   :  { %v645_v16 = vpop.xlane.xlu1 %644 }
 0x54e   :  { %1711 = vrcp.f32 %v645_v16 }
 0x551   :  { %v881_v22 = vpop.permute.xlu1 %880 }
 0x557   :  { %v1710_v17 = vpop.eup %1709 }
 0x558   :  { %v648_v18 = vmul.f32 %v1710_v17, %v1706_v5 }
 0x55a   :  { %1630 = vmatmul.mubr.msk.f32.vlgmr.msra.gmra.mxu0 %vm136_vm2, %v648_v18 }
 0x55b   :  { %v1712_v19 = vpop.eup %1711  ;;  %1638 = vmatpush3.xpose.msk.msra.mxu0 %vm136_vm2, %v805_v12  ;;  %1639 = vmatprep.mubr.msk.f32.mxu0 %vm1800_vm1, %v1799_v6 }
 0x55c   :  { %v649_v20 = vmul.f32 %v1712_v19, %v1708_v10  ;;  %1647 = vmatprep.subr.mxu0 %v1799_v6 }
 0x55e   :  { %1635 = vmatmul.mubr.msk.f32.vlgmr.msra.gmra.mxu1 %vm136_vm2, %v649_v20  ;;  %1640 = vmatmul.mubr.msk.f32.vlgmr.msra.gmra.mxu0 %vm136_vm2, %v803_v21 }
 0x55f   :  { %1643 = vmatpush3.xpose.msk.msra.mxu1 %vm136_vm2, %v883_v13  ;;  %1644 = vmatprep.mubr.msk.f32.mxu1 %vm1800_vm1, %v1799_v6 }
 0x560   :  { %1652 = vmatprep.subr.mxu1 %v1799_v6  ;;  %1649 = vmatprep.mubr.msk.f32.mxu0 %vm1800_vm1, %v1799_v6 }
 0x562   :  { %1645 = vmatmul.mubr.msk.f32.vlgmr.msra.gmra.mxu1 %vm136_vm2, %v881_v22 }
 0x563   :  { %1654 = vmatprep.mubr.msk.f32.mxu1 %vm1800_vm1, %v1799_v6 }
 0x61a   :  { %v1940_v23 = vpop.f32.mrf.mxu0 }
 0x61c   :  { %v1631_v24 = vpop.f32.mrf.mxu0 }
 0x61e   :  { %v1942_v25 = vpop.f32.mrf.mxu1  ;;  %v876_v26 = vpop.f32.mrf.mxu0 }
 0x61f   :  { %v958_v27 = vmul.f32 0.17677669, %v876_v26 }
 0x620   :  { %v1636_v28 = vpop.f32.mrf.mxu1  ;;  %v1641_v29 = vpop.f32.mrf.mxu0 }
 0x621   :  { %v960_v30 = vsel %vm1868_vm3, %v958_v27, -inf }
 0x622   :  { %v954_v31 = vpop.f32.mrf.mxu1  ;;  %v962_v32 = vsel %vm136_vm2, %v960_v30, -inf }
 0x623   :  { %v959_v33 = vmul.f32 0.17677669, %v954_v31  ;;  %963 = vmax.xlane.f32.xlu0 %v962_v32 }
 0x624   :  { %v1646_v34 = vpop.f32.mrf.mxu1 }
 0x625   :  { %v961_v35 = vsel %vm1868_vm3, %v959_v33, -inf }
 0x626   :  { %v965_v36 = vsel %vm136_vm2, %v961_v35, -inf }
 0x627   :  { %966 = vmax.xlane.f32.xlu1 %v965_v36 }
 0x638   :  { %984 = vrot.lane.b32.xlu1 %v1852_v8, %s1808_s26 }
 0x63c   :  { %1138 = vrot.lane.b32.xlu1 %v1852_v8, %s1809_s27 }
 0x640   :  { %1216 = vrot.lane.b32.xlu1 %v1850_v7, %s1809_s27 }
 0x644   :  { %1214 = vrot.lane.b32.xlu1 %v1850_v7, %s1810_s28 }
 0x6ac   :  { %v964_v37 = vpop.xlane.xlu0 %963 }
 0x6ad   :  { %v968_v38 = vsub.f32 %v960_v30, %v964_v37 }
 0x6af   :  { %v970_v39 = vmul.f32 1.442695, %v968_v38 }
 0x6b0   :  { %v967_v40 = vpop.xlane.xlu1 %966 }
 0x6b1   :  { %1713 = vpow2.f32 %v970_v39  ;;  %v969_v41 = vsub.f32 %v961_v35, %v967_v40 }
 0x6b3   :  { %v972_v42 = vmul.f32 1.442695, %v969_v41 }
 0x6b4   :  { %v985_v43 = vpop.permute.xlu1 %984 }
 0x6b5   :  { %1715 = vpow2.f32 %v972_v42  ;;  %1648 = vmatpush3.msra.mxu0 %v985_v43 }
 0x6b6   :  { %1657 = vmatprep.subr.mxu0 %v1799_v6 }
 0x6b8   :  { %v1139_v53 = vpop.permute.xlu1 %1138 }
 0x6bc   :  { %v1217_v57 = vpop.permute.xlu1 %1216 }
 0x6be   :  { %v1714_v44 = vpop.eup %1713 }
 0x6bf   :  { %v974_v45 = vsel %vm136_vm2, %v1714_v44, 0.0 }
 0x6c0   :  { %975 = vadd.xlane.f32.xlu0 %v974_v45  ;;  %v1215_v60 = vpop.permute.xlu1 %1214 }
 0x6c2   :  { %v1716_v46 = vpop.eup %1715 }
 0x6c3   :  { %v977_v48 = vsel %vm136_vm2, %v1716_v46, 0.0 }
 0x6c4   :  { %978 = vadd.xlane.f32.xlu0 %v977_v48 }
 0x6da   :  { %1060 = vrot.lane.b32.xlu0 %v1850_v7, %s1808_s26 }
 0x6de   :  { %1136 = vrot.lane.b32.xlu0 %v1852_v8, %s1810_s28 }
 0x749   :  { %v976_v50 = vpop.xlane.xlu0 %975 }
 0x74a   :  { %1717 = vrcp.f32 %v976_v50 }
 0x74d   :  { %v979_v51 = vpop.xlane.xlu0 %978 }
 0x74e   :  { %1719 = vrcp.f32 %v979_v51 }
 0x751   :  { %v1061_v52 = vpop.permute.xlu0 %1060 }
 0x752   :  { %1653 = vmatpush3.msra.mxu1 %v1061_v52 }
 0x753   :  { %1662 = vmatprep.subr.mxu1 %v1799_v6 }
 0x755   :  { %v1137_v59 = vpop.permute.xlu0 %1136 }
 0x757   :  { %v1718_v54 = vpop.eup %1717 }
 0x758   :  { %v982_v55 = vmul.f32 %v1718_v54, %v1714_v44 }
 0x75a   :  { %1650 = vmatmul.mubr.msk.f32.vlgmr.msra.gmra.mxu0 %vm136_vm2, %v982_v55 }
 0x75b   :  { %v1720_v56 = vpop.eup %1719  ;;  %1658 = vmatpush3.xpose.msk.msra.mxu0 %vm136_vm2, %v1139_v53  ;;  %1659 = vmatprep.mubr.msk.f32.mxu0 %vm1800_vm1, %v1799_v6 }
 0x75c   :  { %v983_v58 = vmul.f32 %v1720_v56, %v1716_v46  ;;  %1667 = vmatprep.subr.mxu0 %v1799_v6 }
 0x75e   :  { %1655 = vmatmul.mubr.msk.f32.vlgmr.msra.gmra.mxu1 %vm136_vm2, %v983_v58  ;;  %1660 = vmatmul.mubr.msk.f32.vlgmr.msra.gmra.mxu0 %vm136_vm2, %v1137_v59 }
 0x75f   :  { %1663 = vmatpush3.xpose.msk.msra.mxu1 %vm136_vm2, %v1217_v57  ;;  %1664 = vmatprep.mubr.msk.f32.mxu1 %vm1800_vm1, %v1799_v6 }
 0x760   :  { %1672 = vmatprep.subr.mxu1 %v1799_v6  ;;  %1669 = vmatprep.mubr.msk.f32.mxu0 %vm1800_vm1, %v1799_v6 }
 0x762   :  { %1665 = vmatmul.mubr.msk.f32.vlgmr.msra.gmra.mxu1 %vm136_vm2, %v1215_v60 }
 0x763   :  { %1674 = vmatprep.mubr.msk.f32.mxu1 %vm1800_vm1, %v1799_v6 }
 0x81a   :  { %v1056_v61 = vpop.f32.mrf.mxu0 }
 0x81c   :  { %v1651_v62 = vpop.f32.mrf.mxu0 }
 0x81e   :  { %v1132_v63 = vpop.f32.mrf.mxu1  ;;  %v1210_v0 = vpop.f32.mrf.mxu0 }
 0x81f   :  { %v1292_v1 = vmul.f32 0.17677669, %v1210_v0 }
 0x820   :  { %v1656_v2 = vpop.f32.mrf.mxu1  ;;  %v1661_v3 = vpop.f32.mrf.mxu0 }
 0x821   :  { %v1294_v4 = vsel %vm1868_vm3, %v1292_v1, -inf }
 0x822   :  { %v1288_v5 = vpop.f32.mrf.mxu1  ;;  %v1296_v9 = vsel %vm136_vm2, %v1294_v4, -inf }
 0x823   :  { %v1293_v10 = vmul.f32 0.17677669, %v1288_v5  ;;  %1297 = vmax.xlane.f32.xlu0 %v1296_v9 }
 0x824   :  { %v1666_v11 = vpop.f32.mrf.mxu1 }
 0x825   :  { %v1295_v12 = vsel %vm1868_vm3, %v1293_v10, -inf }
 0x826   :  { %v1299_v6 = vsel %vm136_vm2, %v1295_v12, -inf }
 0x827   :  { %1300 = vmax.xlane.f32.xlu1 %v1299_v6 }
 0x838   :  { %1318 = vrot.lane.b32.xlu1 %v1852_v8, %s1811_s29 }
 0x83c   :  { %1472 = vrot.lane.b32.xlu1 %v1940_v23, %s1797_s13 }
 0x840   :  { %1474 = vrot.lane.b32.xlu1 %v1942_v25, %s1797_s13 }
 0x844   :  { %1482 = vrot.lane.b32.xlu1 %v1132_v63, %s1812_s30 }
 0x8ac   :  { %v1298_v13 = vpop.xlane.xlu0 %1297 }
 0x8ad   :  { %v1302_v14 = vsub.f32 %v1294_v4, %v1298_v13 }
 0x8af   :  { %v1304_v16 = vmul.f32 1.442695, %v1302_v14 }
 0x8b0   :  { %v1301_v17 = vpop.xlane.xlu1 %1300 }
 0x8b1   :  { %1721 = vpow2.f32 %v1304_v16  ;;  %v1303_v15 = vsub.f32 %v1295_v12, %v1301_v17 }
 0x8b3   :  { %v1306_v18 = vmul.f32 1.442695, %v1303_v15 }
 0x8b4   :  { %v1319_v19 = vpop.permute.xlu1 %1318 }
 0x8b5   :  { %1723 = vpow2.f32 %v1306_v18  ;;  %1668 = vmatpush3.msra.mxu0 %v1319_v19 }
 0x8b8   :  { %v1473_v33 = vpop.permute.xlu1 %1472 }
 0x8b9   :  { %v1494_v36 = vsel %vm136_vm2, %v1904_v47, %v1473_v33 }
 0x8bc   :  { %v1475_v34 = vpop.permute.xlu1 %1474 }
 0x8bd   :  { %v1495_v41 = vsel %vm136_vm2, %v1906_v49, %v1475_v34 }
 0x8be   :  { %v1722_v20 = vpop.eup %1721 }
 0x8bf   :  { %v1308_v8 = vsel %vm136_vm2, %v1722_v20, 0.0 }
 0x8c0   :  { %1309 = vadd.xlane.f32.xlu0 %v1308_v8  ;;  %v1483_v37 = vpop.permute.xlu1 %1482 }
 0x8c1   :  { %v1498_v42 = vsel %vm1496_vm5, %v1495_v41, %v1483_v37 }
 0x8c2   :  { %v1724_v21 = vpop.eup %1723 }
 0x8c3   :  { %v1311_v22 = vsel %vm136_vm2, %v1724_v21, 0.0 }
 0x8c4   :  { %1312 = vadd.xlane.f32.xlu0 %v1311_v22 }
 0x8da   :  { %1394 = vrot.lane.b32.xlu0 %v1850_v7, %s1811_s29 }
 0x8de   :  { %1480 = vrot.lane.b32.xlu0 %v1056_v61, %s1812_s30 }
 0x949   :  { %v1310_v23 = vpop.xlane.xlu0 %1309 }
 0x94a   :  { %1725 = vrcp.f32 %v1310_v23 }
 0x94d   :  { %v1313_v24 = vpop.xlane.xlu0 %1312 }
 0x94e   :  { %1727 = vrcp.f32 %v1313_v24 }
 0x951   :  { %v1395_v25 = vpop.permute.xlu0 %1394 }
 0x952   :  { %1673 = vmatpush3.msra.mxu1 %v1395_v25 }
 0x955   :  { %v1481_v35 = vpop.permute.xlu0 %1480 }
 0x956   :  { %v1497_v38 = vsel %vm1496_vm5, %v1494_v36, %v1481_v35 }
 0x957   :  { %v1726_v26 = vpop.eup %1725 }
 0x958   :  { %v1316_v27 = vmul.f32 %v1726_v26, %v1722_v20 }
 0x95a   :  { %1670 = vmatmul.mubr.msk.f32.vlgmr.msra.gmra.mxu0 %vm136_vm2, %v1316_v27 }
 0x95b   :  { %v1728_v28 = vpop.eup %1727 }
 0x95c   :  { %v1317_v29 = vmul.f32 %v1728_v28, %v1724_v21 }
 0x95e   :  { %1675 = vmatmul.mubr.msk.f32.vlgmr.msra.gmra.mxu1 %vm136_vm2, %v1317_v29 }
 0xa1a   :  { %v1390_v30 = vpop.f32.mrf.mxu0 }
 0xa1b   :  { %1488 = vrot.lane.b32.xlu0 %v1390_v30, %s1813_s3 }
 0xa1c   :  { %v1671_v31 = vpop.f32.mrf.mxu0 }
 0xa1e   :  { %v1466_v7 = vpop.f32.mrf.mxu1 }
 0xa1f   :  { %1490 = vrot.lane.b32.xlu1 %v1466_v7, %s1813_s3 }
 0xa20   :  { %v1676_v32 = vpop.f32.mrf.mxu1 }
 0xa8d   :  { %v1489_v39 = vpop.permute.xlu0 %1488 }
 0xa8e   :  { %v1500_v40 = vsel %vm1499_vm4, %v1497_v38, %v1489_v39 }
 0xa8f   :  { %1502 = vst.msk [vmem:[#allocation7] sm:$0xff] %vm46_vm0, %v1500_v40 }
 0xa91   :  { %v1491_v43 = vpop.permute.xlu1 %1490 }
 0xa92   :  { %v1501_v44 = vsel %vm1499_vm4, %v1498_v42, %v1491_v43 }
 0xa93   :  { %1503 = vst.msk [vmem:[#allocation7 + $0x8] sm:$0xff] %vm46_vm0, %v1501_v44 }
 0xa94   :  { %1780 = shalt.err (!%p1777_p0)
}
 0xa95   :  { %1515 = dma.vmem_to_hbm [thread:$0]  %s1510_s5, 256, %s2006_s2, [#allocation4], %s1796_s12, %s1796_s12, %s1797_s13  }
 0xa96   :  { %1793 = dma.done.wait [#allocation4], 256  }
 0xa97   :  { %1794 = vsyncadd [#allocation4], 4294967040 }
 0xa98   :  { %1519 = vsyncpa [#allocation3], 1 }
 0xa99   :  { %1520 = vsyncpa [#allocation6], 1 }
 0xa9a   :  { %1521 = vsyncpa [#allocation4], 1 }

</bundles_post_ra>
